<compile_context>
chip_gen: v7x
topology: tpu7x:2x2x1
jax: 0.10.0
libtpu: 0.0.40
codegen_flags: <defaults>
</compile_context>

<pallas_src>
import jax
import jax.numpy as jnp
from jax.experimental import pallas as pl
from jax.experimental.pallas import tpu as pltpu

_LANES = 128
_MAX_TILE_ROWS = 8192  # 8192 rows * 128 lanes * 4 B = 4 MiB per buffer


def _copy_kernel(x_ref, o_ref):
    # Straight VMEM tile copy.
    o_ref[...] = x_ref[...]


def text_token_adapter(context):
    """Faithful (and fastest) implementation: a dict projection, no kernel."""
    return context["text_tokens"]


def text_token_adapter_materialized(context):
    """Optional Pallas copy path, used only when a materialized copy is required."""
    x = context["text_tokens"]
    orig_shape = x.shape
    n = x.size

    if n % _LANES == 0:
        # Lane-dense 2D view: last dim = 128 so every store is a full-width vst.
        rows = n // _LANES
        x2 = x.reshape(rows, _LANES)
        tile_rows = rows if rows <= _MAX_TILE_ROWS else _MAX_TILE_ROWS
        grid = (pl.cdiv(rows, tile_rows),)
        spec = pl.BlockSpec((tile_rows, _LANES), lambda i: (i, 0))
    else:
        # Fallback: 2D with a single full-array block (block == array dims, so the
        # (8,128) tiling constraint is satisfied for any shape).
        last = orig_shape[-1]
        lead = n // last
        x2 = x.reshape(lead, last)
        grid = (1,)
        spec = pl.BlockSpec((lead, last), lambda i: (0, 0))

    out2 = pl.pallas_call(
        _copy_kernel,
        out_shape=jax.ShapeDtypeStruct(x2.shape, x2.dtype),
        grid=grid,
        in_specs=[spec],
        out_specs=spec,
        # Output aliases the input buffer (saves the second HBM slab when the
        # input is donated at the jit boundary; XLA inserts a copy otherwise).
        input_output_aliases={0: 0},
        compiler_params=pltpu.CompilerParams(
            dimension_semantics=("parallel",),
        ),
    )(x2)
    return out2.reshape(orig_shape)


if __name__ == "__main__":
    key = jax.random.PRNGKey(0)
    B, S, H = 2, 8, 32
    text_tokens = jax.random.normal(key, (B, S, H), dtype=jnp.float32)

    context = {
        "text_tokens": text_tokens,
        # Extra context entries (ignored by the adapter, as in PyTorch).
        "timestep": jnp.arange(B, dtype=jnp.int32),
    }

    # Primary path: zero-cost identity, exactly the PyTorch semantics.
    out_fast = jax.block_until_ready(text_token_adapter(context))

    # Exercise the Pallas copy kernel once as well.
    out_copy = jax.block_until_ready(text_token_adapter_materialized(context))

    assert out_fast.shape == text_tokens.shape and out_fast.dtype == text_tokens.dtype
    assert out_copy.shape == text_tokens.shape and out_copy.dtype == text_tokens.dtype
    assert jnp.array_equal(out_fast, text_tokens)
    assert jnp.array_equal(out_copy, text_tokens)

    print("KERNEL_OK")
</pallas_src>

<mosaic_0001>
module attributes {stable_mosaic.version = 11 : i64} {
  func.func @_copy_kernel(%arg0: i32, %arg1: memref<4x128xf32, #tpu.memory_space<vmem>>, %arg2: memref<4x128xf32, #tpu.memory_space<vmem>>) attributes {dimension_semantics = [#tpu.dimension_semantics<parallel>], iteration_bounds = array<i64: 1>, scalar_prefetch = 0 : i64, scratch_operands = 0 : i64, tpu.core_type = #tpu.core_type<tc>, window_params = [{transform_indices = @transform_0, window_bounds = array<i64: 4, 128>}, {transform_indices = @transform_1, window_bounds = array<i64: 4, 128>}]} {
    %c0 = arith.constant 0 : index
    %c0_0 = arith.constant 0 : index
    %0 = vector.load %arg1[%c0, %c0_0] : memref<4x128xf32, #tpu.memory_space<vmem>>, vector<4x128xf32>
    %c0_1 = arith.constant 0 : index
    %c0_2 = arith.constant 0 : index
    %1 = vector.load %arg2[%c0_1, %c0_2] : memref<4x128xf32, #tpu.memory_space<vmem>>, vector<4x128xf32>
    tpu.vector_store %arg2[%c0_1, %c0_2], %0 {strides = array<i32>} : memref<4x128xf32, #tpu.memory_space<vmem>>, vector<4x128xf32>,
    return
  }
  func.func @transform_0(%arg0: i32) -> (i32, i32) {
    %c0_i32 = arith.constant 0 : i32
    %c0_i32_0 = arith.constant 0 : i32
    return %arg0, %c0_i32 : i32, i32
  }
  func.func @transform_1(%arg0: i32) -> (i32, i32) {
    %c0_i32 = arith.constant 0 : i32
    %c0_i32_0 = arith.constant 0 : i32
    return %arg0, %c0_i32 : i32, i32
  }
}

</mosaic_0001>

<bundles_post_ra>
// kernel: tpu_custom_call.1
= control target key start
LH: loop header
LB: loop body
LE: loop exit
PB: predicated region body
PF: predicated region fallthrough
CT: control target
= control target key end

     0   :  { %6 = vsyncpa [#allocation3], 0  ;;  %s124_s0 = inlined_call_operand.hbm [shape: f32[4,128], index: 0, kind: input, shape index: {}, may-alias: {0,1}]   ;;  %s125_s1 = inlined_call_operand.hbm [shape: f32[4,128], index: 1, kind: output, shape index: {}, may-alias: {0,1}]  }
   0x1   :  { %7 = vsyncpa [#allocation4], 0  ;;  %s88_s6 = smov [#allocation2]   ;;  %s40_s10 = scalar_lea.hbm %s124_s0, 64 }
   0x2   :  { %s14_s7 = sshll.u32 %s88_s6, 4  ;;  %p41_p0 = scmp.ne.s32.totalorder %s124_s0, %s40_s10  ;;  %s15_s7 = int_to_ptr.vmem [resolvable:$true] %s14_s7 }
   0x3   :  { %p44_p1 = scmp.lt.u32.totalorder %s40_s10, %s124_s0 }
   0x5   :  { %p46_p2 = pnand %p44_p1, %p41_p0 }
   0x7   :  { %49 = shalt.err (!%p46_p2)
}
   0x8   :  { %s50_s15 = scalar_lea.vmem %s15_s7, 64  ;;  %p55_p4 = scmp.lt.s32.totalorder %s15_s7, %s15_s7 }
   0x9   :  { %p51_p3 = scmp.ne.s32.totalorder %s15_s7, %s50_s15  ;;  %p56_p5 = scmp.lt.s32.totalorder %s50_s15, %s50_s15 }
   0xb   :  { %p57_p6 = por %p56_p5, %p55_p4 }
   0xd   :  { %p58_p7 = pnand %p57_p6, %p51_p3 }
   0xf   :  { %61 = shalt.err (!%p58_p7)
}
  0x10   :  { %17 = dma.hbm_to_vmem [thread:$0]  %s124_s0, 64, %s15_s7, [#allocation3]  }
  0x11   :  { %84 = dma.done.wait [#allocation3], 64  }
  0x12   :  { %85 = vsyncadd [#allocation3], 4294967232  ;;  %s89_s18 = smov [#allocation5]   ;;  %v21_v0 = vld [vmem:[#allocation2] sm:$0xf] }
  0x13   :  { %s29_s19 = sshll.u32 %s89_s18, 4  ;;  %22 = vst [vmem:[#allocation5] sm:$0xf] %v21_v0  ;;  %s30_s19 = int_to_ptr.vmem [resolvable:$true] %s29_s19 }
  0x14   :  { %s62_s20 = scalar_lea.vmem %s30_s19, 64  ;;  %p67_p9 = scmp.lt.s32.totalorder %s30_s19, %s30_s19 }
  0x15   :  { %p63_p8 = scmp.ne.s32.totalorder %s30_s19, %s62_s20  ;;  %p68_p10 = scmp.lt.s32.totalorder %s62_s20, %s62_s20 }
  0x17   :  { %p69_p11 = por %p68_p10, %p67_p9 }
  0x19   :  { %p70_p12 = pnand %p69_p11, %p63_p8 }
  0x1b   :  { %73 = shalt.err (!%p70_p12)
}
  0x1c   :  { %s74_s23 = scalar_lea.hbm %s125_s1, 64 }
  0x1d   :  { %p75_p13 = scmp.ne.s32.totalorder %s125_s1, %s74_s23  ;;  %p78_p0 = scmp.lt.u32.totalorder %s74_s23, %s125_s1 }
  0x1f   :  { %p80_p1 = pnand %p78_p0, %p75_p13 }
  0x21   :  { %83 = shalt.err (!%p80_p1)
}
  0x22   :  { %32 = dma.vmem_to_hbm [thread:$0]  %s30_s19, 64, %s125_s1, [#allocation4]  }
  0x23   :  { %86 = dma.done.wait [#allocation4], 64  }
  0x24   :  { %87 = vsyncadd [#allocation4], 4294967232 }
  0x25   :  { %36 = vsyncpa [#allocation3], 1 }
  0x26   :  { %37 = vsyncpa [#allocation4], 1 }

</bundles_post_ra>
